<compile_context>
chip_gen: v7x
topology: tpu7x:2x2x1
jax: 0.10.0
libtpu: 0.0.40
codegen_flags: <defaults>
</compile_context>

<pallas_src>
import functools

import jax
import jax.numpy as jnp
from jax.experimental import pallas as pl
from jax.experimental.pallas import tpu as pltpu

LANE = 128          # padded feature width for every layer (native on v5e's 128x128 MXU)
W_ROWS = 3 * LANE   # bf16 weight slab rows: w1 | w2 | w3, each padded to [128, 128]
BIAS_ROWS = 8       # one sublane-aligned f32 bias block; rows 0,1,2 = b1,b2,b3


def _dqn_kernel(x_ref, w_ref, b_ref, o_ref, xpad_ref, *, state_size, action_size):
    # Lane-pad x to 128 inside the kernel (scratch lanes >= state_size are exactly 0).
    # Re-zeroed every grid step so correctness holds when the batch axis is sharded
    # across TensorCores (each TC has its own VMEM / scratch instance).
    xpad_ref[...] = jnp.zeros_like(xpad_ref)
    xpad_ref[:, :state_size] = x_ref[...]
    xb = xpad_ref[...].astype(jnp.bfloat16)                  # [TB, 128]

    # Static, aligned views into the pre-cast bf16 weight slab (no per-step casts).
    w1 = w_ref[0 * LANE:1 * LANE, :]                          # [128, 128] bf16
    w2 = w_ref[1 * LANE:2 * LANE, :]
    w3 = w_ref[2 * LANE:3 * LANE, :]
    b1 = b_ref[0:1, :]                                        # [1, 128] f32
    b2 = b_ref[1:2, :]
    b3 = b_ref[2:3, :]

    # fc1 + ReLU (bf16 MXU operands, f32 accumulation, f32 elementwise)
    h1 = jnp.dot(xb, w1, preferred_element_type=jnp.float32)
    h1 = jnp.maximum(h1 + b1, 0.0)
    # fc2 + ReLU
    h2 = jnp.dot(h1.astype(jnp.bfloat16), w2, preferred_element_type=jnp.float32)
    h2 = jnp.maximum(h2 + b2, 0.0)
    # fc3 (no activation); write only the real action columns.
    q = jnp.dot(h2.astype(jnp.bfloat16), w3, preferred_element_type=jnp.float32) + b3
    o_ref[...] = q[:, :action_size].astype(o_ref.dtype)


def pack_params(params):
    """Pack once: weights -> one bf16 [384,128] slab; biases -> one f32 [8,128] block."""
    def pad_w(w):
        w = jnp.asarray(w, jnp.float32)
        return jnp.pad(w, ((0, LANE - w.shape[0]), (0, LANE - w.shape[1])))

    def pad_b(b):
        b = jnp.asarray(b, jnp.float32).reshape(1, -1)
        return jnp.pad(b, ((0, 0), (0, LANE - b.shape[1])))

    w_slab = jnp.concatenate(
        [pad_w(params["w1"]), pad_w(params["w2"]), pad_w(params["w3"])], axis=0
    ).astype(jnp.bfloat16)
    b_block = jnp.concatenate(
        [pad_b(params["b1"]), pad_b(params["b2"]), pad_b(params["b3"]),
         jnp.zeros((BIAS_ROWS - 3, LANE), jnp.float32)], axis=0)
    return w_slab, b_block


def _batch_tile(batch):
    # <=256: one grid step (block == full batch is always a legal block shape).
    # >256: >=2 steps so "parallel" can shard across v7x's 2 TCs; tile capped at 1024.
    if batch <= 256:
        return batch
    half = -(-batch // 2)
    half = -(-half // 8) * 8
    return min(1024, half)


@functools.partial(jax.jit, static_argnums=(3,))
def dqn_forward(x, w_slab, b_block, action_size):
    """x: [B, state_size] f32; (w_slab, b_block) from pack_params (built once)."""
    batch, state_size = x.shape
    tb = _batch_tile(batch)
    kernel = functools.partial(_dqn_kernel, state_size=state_size,
                               action_size=action_size)
    return pl.pallas_call(
        kernel,
        out_shape=jax.ShapeDtypeStruct((batch, action_size), jnp.float32),
        grid=(pl.cdiv(batch, tb),),
        in_specs=[
            pl.BlockSpec((tb, state_size), lambda i: (i, 0)),   # x batch tile (no pad)
            pl.BlockSpec((W_ROWS, LANE), lambda i: (0, 0)),     # bf16 weight slab
            pl.BlockSpec((BIAS_ROWS, LANE), lambda i: (0, 0)),  # f32 bias block
        ],
        out_specs=pl.BlockSpec((tb, action_size), lambda i: (i, 0)),  # real columns only
        scratch_shapes=[pltpu.VMEM((tb, LANE), jnp.float32)],         # lane-padded x
        compiler_params=pltpu.CompilerParams(
            dimension_semantics=("parallel",)),
    )(x.astype(jnp.float32), w_slab, b_block)


def init_params(key, state_size=9, action_size=3, hidden=24):
    """PyTorch nn.Linear-style init (U[-1/sqrt(fan_in), +1/sqrt(fan_in)]), stored [in, out]."""
    ks = jax.random.split(key, 6)

    def linear(kw, kb, fan_in, fan_out):
        bound = 1.0 / jnp.sqrt(jnp.float32(fan_in))
        w = jax.random.uniform(kw, (fan_in, fan_out), jnp.float32, -bound, bound)
        b = jax.random.uniform(kb, (1, fan_out), jnp.float32, -bound, bound)
        return w, b

    w1, b1 = linear(ks[0], ks[1], state_size, hidden)
    w2, b2 = linear(ks[2], ks[3], hidden, hidden)
    w3, b3 = linear(ks[4], ks[5], hidden, action_size)
    return {"w1": w1, "b1": b1, "w2": w2, "b2": b2, "w3": w3, "b3": b3}


if __name__ == "__main__":
    key = jax.random.PRNGKey(0)
    k_x, k_p = jax.random.split(key)

    state_size, action_size, hidden = 9, 3, 24
    params = init_params(k_p, state_size=state_size, action_size=action_size, hidden=hidden)
    w_slab, b_block = pack_params(params)   # built once; reused across every forward call

    def ref_bf16(x):  # matches kernel numerics: bf16 matmul operands, f32 accumulation
        bf = lambda a: a.astype(jnp.bfloat16)
        h1 = jnp.maximum(jnp.dot(bf(x), bf(params["w1"]),
                                 preferred_element_type=jnp.float32) + params["b1"], 0.0)
        h2 = jnp.maximum(jnp.dot(bf(h1), bf(params["w2"]),
                                 preferred_element_type=jnp.float32) + params["b2"], 0.0)
        return jnp.dot(bf(h2), bf(params["w3"]),
                       preferred_element_type=jnp.float32) + params["b3"]

    def ref_f32(x):   # full-f32 PyTorch-equivalent math (looser tolerance)
        h1 = jnp.maximum(x @ params["w1"] + params["b1"], 0.0)
        h2 = jnp.maximum(h1 @ params["w2"] + params["b2"], 0.0)
        return h2 @ params["w3"] + params["b3"]

    # B=8: single block; B=37: single block, batch not a multiple of 8;
    # B=300: tiled path (grid=2) with a ragged last block.
    for i, B in enumerate([8, 37, 300]):
        xb = jax.random.normal(jax.random.fold_in(k_x, i), (B, state_size), jnp.float32)
        out = jax.block_until_ready(dqn_forward(xb, w_slab, b_block, action_size))
        assert out.shape == (B, action_size)
        rb = ref_bf16(xb)
        assert jnp.allclose(out, rb, atol=2e-3, rtol=2e-3), \
            f"B={B}: max abs err vs bf16 ref {jnp.max(jnp.abs(out - rb))}"
        r32 = ref_f32(xb)
        assert jnp.allclose(out, r32, atol=5e-2, rtol=5e-2), \
            f"B={B}: max abs err vs f32 ref {jnp.max(jnp.abs(out - r32))}"

    print("KERNEL_OK")
</pallas_src>

<mosaic_0001>
module attributes {stable_mosaic.version = 11 : i64} {
  func.func @_dqn_kernel(%arg0: i32, %arg1: memref<8x9xf32, #tpu.memory_space<vmem>>, %arg2: memref<384x128xbf16, #tpu.memory_space<vmem>>, %arg3: memref<8x128xf32, #tpu.memory_space<vmem>>, %arg4: memref<8x3xf32, #tpu.memory_space<vmem>>, %arg5: memref<8x128xf32, #tpu.memory_space<vmem>>) attributes {dimension_semantics = [#tpu.dimension_semantics<parallel>], iteration_bounds = array<i64: 1>, scalar_prefetch = 0 : i64, scratch_operands = 1 : i64, tpu.core_type = #tpu.core_type<tc>, window_params = [{transform_indices = @transform_0, window_bounds = array<i64: 8, 9>}, {pipeline_mode = #tpu.pipeline_mode<synchronous>, transform_indices = @transform_1, window_bounds = array<i64: 384, 128>}, {pipeline_mode = #tpu.pipeline_mode<synchronous>, transform_indices = @transform_2, window_bounds = array<i64: 8, 128>}, {transform_indices = @transform_3, window_bounds = array<i64: 8, 3>}]} {
    %cst = arith.constant 0.000000e+00 : f32
    %0 = vector.broadcast %cst : f32 to vector<8x128xf32>
    %c0 = arith.constant 0 : index
    %c0_0 = arith.constant 0 : index
    %1 = vector.load %arg5[%c0, %c0_0] : memref<8x128xf32, #tpu.memory_space<vmem>>, vector<8x128xf32>
    tpu.vector_store %arg5[%c0, %c0_0], %0 {strides = array<i32>} : memref<8x128xf32, #tpu.memory_space<vmem>>, vector<8x128xf32>,
    %c0_1 = arith.constant 0 : index
    %c0_2 = arith.constant 0 : index
    %2 = vector.load %arg1[%c0_1, %c0_2] : memref<8x9xf32, #tpu.memory_space<vmem>>, vector<8x9xf32>
    %c0_3 = arith.constant 0 : index
    %c0_4 = arith.constant 0 : index
    %3 = vector.load %arg5[%c0_3, %c0_4] : memref<8x128xf32, #tpu.memory_space<vmem>>, vector<8x9xf32>
    tpu.vector_store %arg5[%c0_3, %c0_4], %2 {strides = array<i32>} : memref<8x128xf32, #tpu.memory_space<vmem>>, vector<8x9xf32>,
    %c0_5 = arith.constant 0 : index
    %c0_6 = arith.constant 0 : index
    %4 = vector.load %arg5[%c0_5, %c0_6] : memref<8x128xf32, #tpu.memory_space<vmem>>, vector<8x128xf32>
    %5 = arith.truncf %4 : vector<8x128xf32> to vector<8x128xbf16>
    %c0_7 = arith.constant 0 : index
    %c0_8 = arith.constant 0 : index
    %6 = vector.load %arg2[%c0_7, %c0_8] : memref<384x128xbf16, #tpu.memory_space<vmem>>, vector<128x128xbf16>
    %c128 = arith.constant 128 : index
    %c0_9 = arith.constant 0 : index
    %7 = vector.load %arg2[%c128, %c0_9] : memref<384x128xbf16, #tpu.memory_space<vmem>>, vector<128x128xbf16>
    %c256 = arith.constant 256 : index
    %c0_10 = arith.constant 0 : index
    %8 = vector.load %arg2[%c256, %c0_10] : memref<384x128xbf16, #tpu.memory_space<vmem>>, vector<128x128xbf16>
    %c0_11 = arith.constant 0 : index
    %c0_12 = arith.constant 0 : index
    %9 = vector.load %arg3[%c0_11, %c0_12] : memref<8x128xf32, #tpu.memory_space<vmem>>, vector<1x128xf32>
    %c1 = arith.constant 1 : index
    %c0_13 = arith.constant 0 : index
    %10 = vector.load %arg3[%c1, %c0_13] : memref<8x128xf32, #tpu.memory_space<vmem>>, vector<1x128xf32>
    %c2 = arith.constant 2 : index
    %c0_14 = arith.constant 0 : index
    %11 = vector.load %arg3[%c2, %c0_14] : memref<8x128xf32, #tpu.memory_space<vmem>>, vector<1x128xf32>
    %cst_15 = arith.constant dense<0.000000e+00> : vector<8x128xf32>
    %12 = tpu.matmul %5, %6, %cst_15 {dimension_numbers = #tpu.dot_dimension_numbers<[1], [0], [0], [1], [0, 0, 1, 1], [], []>} : vector<8x128xbf16>, vector<128x128xbf16>, vector<8x128xf32> -> vector<8x128xf32>
    %13 = vector.broadcast %9 : vector<1x128xf32> to vector<8x128xf32>
    %14 = arith.addf %12, %13 : vector<8x128xf32>
    %cst_16 = arith.constant 0.000000e+00 : f32
    %15 = vector.broadcast %cst_16 : f32 to vector<8x128xf32>
    %16 = arith.maximumf %14, %15 : vector<8x128xf32>
    %17 = arith.truncf %16 : vector<8x128xf32> to vector<8x128xbf16>
    %cst_17 = arith.constant dense<0.000000e+00> : vector<8x128xf32>
    %18 = tpu.matmul %17, %7, %cst_17 {dimension_numbers = #tpu.dot_dimension_numbers<[1], [0], [0], [1], [0, 0, 1, 1], [], []>} : vector<8x128xbf16>, vector<128x128xbf16>, vector<8x128xf32> -> vector<8x128xf32>
    %19 = vector.broadcast %10 : vector<1x128xf32> to vector<8x128xf32>
    %20 = arith.addf %18, %19 : vector<8x128xf32>
    %cst_18 = arith.constant 0.000000e+00 : f32
    %21 = vector.broadcast %cst_18 : f32 to vector<8x128xf32>
    %22 = arith.maximumf %20, %21 : vector<8x128xf32>
    %23 = arith.truncf %22 : vector<8x128xf32> to vector<8x128xbf16>
    %cst_19 = arith.constant dense<0.000000e+00> : vector<8x128xf32>
    %24 = tpu.matmul %23, %8, %cst_19 {dimension_numbers = #tpu.dot_dimension_numbers<[1], [0], [0], [1], [0, 0, 1, 1], [], []>} : vector<8x128xbf16>, vector<128x128xbf16>, vector<8x128xf32> -> vector<8x128xf32>
    %25 = vector.broadcast %11 : vector<1x128xf32> to vector<8x128xf32>
    %26 = arith.addf %24, %25 : vector<8x128xf32>
    %27 = vector.extract_strided_slice %26 {offsets = [0, 0], sizes = [8, 3], strides = [1, 1]} : vector<8x128xf32> to vector<8x3xf32>
    %c0_20 = arith.constant 0 : index
    %c0_21 = arith.constant 0 : index
    %28 = vector.load %arg4[%c0_20, %c0_21] : memref<8x3xf32, #tpu.memory_space<vmem>>, vector<8x3xf32>
    tpu.vector_store %arg4[%c0_20, %c0_21], %27 {strides = array<i32>} : memref<8x3xf32, #tpu.memory_space<vmem>>, vector<8x3xf32>,
    return
  }
  func.func @transform_0(%arg0: i32) -> (i32, i32) {
    %c0_i32 = arith.constant 0 : i32
    %c0_i32_0 = arith.constant 0 : i32
    return %arg0, %c0_i32 : i32, i32
  }
  func.func @transform_1(%arg0: i32) -> (i32, i32) {
    %c0_i32 = arith.constant 0 : i32
    %c0_i32_0 = arith.constant 0 : i32
    %c0_i32_1 = arith.constant 0 : i32
    return %c0_i32, %c0_i32_0 : i32, i32
  }
  func.func @transform_2(%arg0: i32) -> (i32, i32) {
    %c0_i32 = arith.constant 0 : i32
    %c0_i32_0 = arith.constant 0 : i32
    %c0_i32_1 = arith.constant 0 : i32
    return %c0_i32, %c0_i32_0 : i32, i32
  }
  func.func @transform_3(%arg0: i32) -> (i32, i32) {
    %c0_i32 = arith.constant 0 : i32
    %c0_i32_0 = arith.constant 0 : i32
    return %arg0, %c0_i32 : i32, i32
  }
}

</mosaic_0001>

<bundles_post_ra>
// kernel: dqn_forward.1
= control target key start
LH: loop header
LB: loop body
LE: loop exit
PB: predicated region body
PF: predicated region fallthrough
CT: control target
= control target key end

     0   :  { %8 = vsyncpa [#allocation4], 0  ;;  %s709_s0 = inlined_call_operand.hbm [shape: f32[8,9], index: 0, kind: input, shape index: {}]   ;;  %s710_s1 = inlined_call_operand.hbm [shape: bf16[384,128], index: 1, kind: input, shape index: {}]   ;;  %s711_s2 = inlined_call_operand.hbm [shape: f32[8,128], index: 2, kind: input, shape index: {}]   ;;  %s712_s3 = inlined_call_operand.vmem [shape: f32[8,3], index: 3, kind: output, shape index: {}]  }
   0x1   :  { %9 = vsyncpa [#allocation6], 0  ;;  %s612_s12 = smov [#allocation5]   ;;  %s542_s16 = scalar_lea.hbm %s710_s1, 3072 }
   0x2   :  { %s25_s13 = sshll.u32 %s612_s12, 4  ;;  %p543_p0 = scmp.ne.s32.totalorder %s710_s1, %s542_s16  ;;  %s26_s13 = int_to_ptr.vmem [resolvable:$true] %s25_s13 }
   0x3   :  { %p546_p1 = scmp.lt.u32.totalorder %s542_s16, %s710_s1 }
   0x5   :  { %p548_p2 = pnand %p546_p1, %p543_p0 }
   0x7   :  { %551 = shalt.err (!%p548_p2)
}
   0x8   :  { %s552_s21 = scalar_lea.vmem %s26_s13, 3072  ;;  %p557_p4 = scmp.lt.s32.totalorder %s26_s13, %s26_s13 }
   0x9   :  { %p553_p3 = scmp.ne.s32.totalorder %s26_s13, %s552_s21  ;;  %p558_p5 = scmp.lt.s32.totalorder %s552_s21, %s552_s21 }
   0xb   :  { %p559_p6 = por %p558_p5, %p557_p4 }
   0xd   :  { %p560_p7 = pnand %p559_p6, %p553_p3 }
   0xf   :  { %563 = shalt.err (!%p560_p7)
}
  0x10   :  { %s613_s22 = smov 64   ;;  %s614_s23 = smov 4  }
  0x11   :  { %31 = dma.hbm_to_vmem [thread:$0]  %s710_s1, 3072, %s26_s13, [#allocation6], %s613_s22, %s613_s22, %s614_s23  }
  0x12   :  { %s615_s26 = smov [#allocation3]   ;;  %s616_s28 = smov [#allocation7]  }
  0x13   :  { %s16_s27 = sshll.u32 %s615_s26, 4  ;;  %s38_s29 = sshll.u32 %s616_s28, 4  ;;  %s17_s27 = int_to_ptr.vmem [resolvable:$true] %s16_s27  ;;  %s39_s29 = int_to_ptr.vmem [resolvable:$true] %s38_s29 }
  0x14   :  { %s564_s5 = scalar_lea.hbm %s709_s0, 128 }
  0x15   :  { %p565_p8 = scmp.ne.s32.totalorder %s709_s0, %s564_s5  ;;  %p568_p9 = scmp.lt.u32.totalorder %s564_s5, %s709_s0 }
  0x17   :  { %p570_p10 = pnand %p568_p9, %p565_p8 }
  0x19   :  { %573 = shalt.err (!%p570_p10)
}
  0x1a   :  { %s574_s1 = scalar_lea.vmem %s17_s27, 128  ;;  %p579_p12 = scmp.lt.s32.totalorder %s17_s27, %s17_s27 }
  0x1b   :  { %p575_p11 = scmp.ne.s32.totalorder %s17_s27, %s574_s1  ;;  %p580_p13 = scmp.lt.s32.totalorder %s574_s1, %s574_s1 }
  0x1d   :  { %p581_p0 = por %p580_p13, %p579_p12 }
  0x1f   :  { %p582_p1 = pnand %p581_p0, %p575_p11 }
  0x21   :  { %585 = shalt.err (!%p582_p1)
}
  0x22   :  { %19 = dma.hbm_to_vmem [thread:$0]  %s709_s0, 128, %s17_s27, [#allocation4]  }
  0x23   :  { %s586_s14 = scalar_lea.hbm %s711_s2, 128 }
  0x24   :  { %p587_p2 = scmp.ne.s32.totalorder %s711_s2, %s586_s14  ;;  %p590_p3 = scmp.lt.u32.totalorder %s586_s14, %s711_s2 }
  0x26   :  { %p592_p4 = pnand %p590_p3, %p587_p2 }
  0x28   :  { %595 = shalt.err (!%p592_p4)
}
  0x29   :  { %s596_s19 = scalar_lea.vmem %s39_s29, 128  ;;  %p601_p6 = scmp.lt.s32.totalorder %s39_s29, %s39_s29 }
  0x2a   :  { %p597_p5 = scmp.ne.s32.totalorder %s39_s29, %s596_s19  ;;  %p602_p7 = scmp.lt.s32.totalorder %s596_s19, %s596_s19 }
  0x2c   :  { %p603_p8 = por %p602_p7, %p601_p6 }
  0x2e   :  { %p604_p9 = pnand %p603_p8, %p597_p5 }
  0x30   :  { %607 = shalt.err (!%p604_p9)
}
  0x31   :  { %41 = dma.hbm_to_vmem [thread:$0]  %s711_s2, 128, %s39_s29, [#allocation6]  }
  0x32   :  { %608 = dma.done.wait [#allocation4], 128  }
  0x33   :  { %609 = vsyncadd [#allocation4], 4294967168 }
  0x34   :  { %610 = dma.done.wait [#allocation6], 3200  }
  0x35   :  { %611 = vsyncadd [#allocation6], 4294964096  ;;  %v617_v0 = vmov 0.0   ;;  %vm618_vm0 = vmmov 0   ;;  %v518_v1 = vld [vmem:[#allocation5] sm:$0xff]   ;;  %v519_v2 = vld [vmem:[#allocation5 + $0x8] sm:$0xff]  }
  0x36   :  { %451 = vmatprep.subr.bf16.mxu0 %v617_v0  ;;  %52 = vst [vmem:[#allocation2] sm:$0xff] %v617_v0  ;;  %467 = vmatprep.mubr.msk.bf16.mxu0 %vm618_vm0, %v617_v0  ;;  %v520_v3 = vld [vmem:[#allocation5 + $0x10] sm:$0xff]   ;;  %vm54_vm1 = vcmask 72704   ;;  %v53_v4 = vld [vmem:[#allocation3] sm:$0xff]  ;;  %v526_v5 = vld [vmem:[#allocation5 + $0x40] sm:$0xff]   ;;  %vm389_vm2 = vcmask 23552  }
  0x37   :  { %471 = vmatprep.subr.bf16.mxu1 %v617_v0  ;;  %487 = vmatprep.mubr.msk.bf16.mxu1 %vm618_vm0, %v617_v0  ;;  %55 = vst.msk [vmem:[#allocation2] sm:$0xff] %vm54_vm1, %v53_v4  ;;  %v521_v6 = vld [vmem:[#allocation5 + $0x18] sm:$0xff]   ;;  %v527_v7 = vld [vmem:[#allocation5 + $0x48] sm:$0xff]   ;;  %v522_v8 = vld [vmem:[#allocation5 + $0x20] sm:$0xff]  }
  0x38   :  { %452 = vmatpush3.bf16.msra.mxu0 %v518_v1  ;;  %472 = vmatpush3.bf16.msra.mxu1 %v526_v5  ;;  %v528_v9 = vld [vmem:[#allocation5 + $0x50] sm:$0xff]   ;;  %v523_v10 = vld [vmem:[#allocation5 + $0x28] sm:$0xff]   ;;  %v529_v11 = vld [vmem:[#allocation5 + $0x58] sm:$0xff]  }
  0x39   :  { %453 = vmatprep.subr.bf16.mxu0 %v617_v0  ;;  %473 = vmatprep.subr.bf16.mxu1 %v617_v0  ;;  %v524_v12 = vld [vmem:[#allocation5 + $0x30] sm:$0xff]   ;;  %v530_v13 = vld [vmem:[#allocation5 + $0x60] sm:$0xff]   ;;  %v525_v14 = vld [vmem:[#allocation5 + $0x38] sm:$0xff]  }
  0x3a   :  { %v531_v16 = vld [vmem:[#allocation5 + $0x68] sm:$0xff]   ;;  %v532_v18 = vld [vmem:[#allocation5 + $0x70] sm:$0xff]   ;;  %v533_v19 = vld [vmem:[#allocation5 + $0x78] sm:$0xff]  }
  0x3b   :  { %v534_v20 = vld [vmem:[#allocation5 + $0x80] sm:$0xff]   ;;  %v535_v21 = vld [vmem:[#allocation5 + $0x88] sm:$0xff]   ;;  %v536_v22 = vld [vmem:[#allocation5 + $0x90] sm:$0xff]  }
  0x3c   :  { %454 = vmatpush3.bf16.msra.mxu0 %v519_v2  ;;  %474 = vmatpush3.bf16.msra.mxu1 %v527_v7  ;;  %v537_v23 = vld [vmem:[#allocation5 + $0x98] sm:$0xff]   ;;  %v538_v24 = vld [vmem:[#allocation5 + $0xa0] sm:$0xff]   ;;  %v539_v25 = vld [vmem:[#allocation5 + $0xa8] sm:$0xff]  }
  0x3d   :  { %455 = vmatprep.subr.bf16.mxu0 %v617_v0  ;;  %475 = vmatprep.subr.bf16.mxu1 %v617_v0  ;;  %v397_v26 = vld [vmem:[#allocation7] ss:$0 sm:$0xff]  ;;  %v540_v34 = vld [vmem:[#allocation5 + $0xb0] sm:$0xff]   ;;  %v541_v35 = vld [vmem:[#allocation5 + $0xb8] sm:$0xff]  }
  0x3e   :  { %v56_v15 = vld [vmem:[#allocation2] sm:$0xff]  ;;  %v406_v36 = vld [vmem:[#allocation7 + $0x1] ss:$0 sm:$0xff]  ;;  %v415_v44 = vld [vmem:[#allocation7 + $0x2] ss:$0 sm:$0xff] }
  0x3f   :  { %v57_v17 = vpack.c.bf16 %v56_v15, %v56_v15 }
  0x40   :  { %456 = vmatpush3.bf16.msra.mxu0 %v520_v3  ;;  %476 = vmatpush3.bf16.msra.mxu1 %v528_v9 }
  0x41   :  { %457 = vmatprep.subr.bf16.mxu0 %v617_v0  ;;  %477 = vmatprep.subr.bf16.mxu1 %v617_v0 }
  0x44   :  { %458 = vmatpush3.bf16.msra.mxu0 %v521_v6  ;;  %478 = vmatpush3.bf16.msra.mxu1 %v529_v11 }
  0x45   :  { %459 = vmatprep.subr.bf16.mxu0 %v617_v0  ;;  %479 = vmatprep.subr.bf16.mxu1 %v617_v0 }
  0x48   :  { %460 = vmatpush3.bf16.msra.mxu0 %v522_v8  ;;  %480 = vmatpush3.bf16.msra.mxu1 %v530_v13 }
  0x49   :  { %461 = vmatprep.subr.bf16.mxu0 %v617_v0  ;;  %481 = vmatprep.subr.bf16.mxu1 %v617_v0 }
  0x4c   :  { %462 = vmatpush3.bf16.msra.mxu0 %v523_v10  ;;  %482 = vmatpush3.bf16.msra.mxu1 %v531_v16 }
  0x4d   :  { %463 = vmatprep.subr.bf16.mxu0 %v617_v0  ;;  %483 = vmatprep.subr.bf16.mxu1 %v617_v0 }
  0x50   :  { %464 = vmatpush3.bf16.msra.mxu0 %v524_v12  ;;  %484 = vmatpush3.bf16.msra.mxu1 %v532_v18 }
  0x51   :  { %465 = vmatprep.subr.bf16.mxu0 %v617_v0  ;;  %485 = vmatprep.subr.bf16.mxu1 %v617_v0 }
  0x54   :  { %466 = vmatpush3.bf16.msra.mxu0 %v525_v14  ;;  %486 = vmatpush3.bf16.msra.mxu1 %v533_v19 }
  0x55   :  { %491 = vmatprep.subr.bf16.mxu0 %v617_v0 }
  0x57   :  { %468 = vmatmul.mubr.bf16.vlgmr.msra.gmra.mrb[0].mxu0 %v57_v17 }
  0x58   :  { %507 = vmatprep.mubr.msk.bf16.mxu0 %vm618_vm0, %v617_v0  ;;  %492 = vmatpush3.bf16.msra.mxu0 %v534_v20 }
  0x59   :  { %493 = vmatprep.subr.bf16.mxu0 %v617_v0 }
  0x5c   :  { %494 = vmatpush3.bf16.msra.mxu0 %v535_v21 }
  0x5d   :  { %495 = vmatprep.subr.bf16.mxu0 %v617_v0 }
  0x60   :  { %496 = vmatpush3.bf16.msra.mxu0 %v536_v22 }
  0x61   :  { %497 = vmatprep.subr.bf16.mxu0 %v617_v0 }
  0x64   :  { %498 = vmatpush3.bf16.msra.mxu0 %v537_v23 }
  0x65   :  { %499 = vmatprep.subr.bf16.mxu0 %v617_v0 }
  0x68   :  { %500 = vmatpush3.bf16.msra.mxu0 %v538_v24 }
  0x69   :  { %501 = vmatprep.subr.bf16.mxu0 %v617_v0 }
  0x6c   :  { %502 = vmatpush3.bf16.msra.mxu0 %v539_v25 }
  0x6d   :  { %503 = vmatprep.subr.bf16.mxu0 %v617_v0 }
  0x70   :  { %504 = vmatpush3.bf16.msra.mxu0 %v540_v34 }
  0x71   :  { %505 = vmatprep.subr.bf16.mxu0 %v617_v0 }
  0x74   :  { %506 = vmatpush3.bf16.msra.mxu0 %v541_v35 }
 0x12a   :  { %v195_v27 = vpop.f32.mrb[0].mxu0 }
 0x12b   :  { %v196_v28 = vadd.f32 %v397_v26, %v195_v27  ;;  %v469_v29 = vpop.f32.mrb[1].mxu0 }
 0x12c   :  { %v198_v30 = vpop.f32.mrb[2].mxu0 }
 0x12d   :  { %v201_v31 = vmax.f32 %v196_v28, 0.0  ;;  %v470_v32 = vpop.f32.mrb[3].mxu0 }
 0x12f   :  { %v202_v33 = vpack.c.bf16 %v201_v31, %v201_v31 }
 0x131   :  { %488 = vmatmul.mubr.bf16.vlgmr.msra.gmra.mrb[0].mxu1 %v202_v33 }
 0x204   :  { %v289_v37 = vpop.f32.mrb[0].mxu1 }
 0x205   :  { %v290_v38 = vadd.f32 %v406_v36, %v289_v37  ;;  %v489_v39 = vpop.f32.mrb[1].mxu1 }
 0x206   :  { %v292_v40 = vpop.f32.mrb[2].mxu1 }
 0x207   :  { %v295_v41 = vmax.f32 %v290_v38, 0.0  ;;  %v490_v42 = vpop.f32.mrb[3].mxu1 }
 0x209   :  { %v296_v43 = vpack.c.bf16 %v295_v41, %v295_v41 }
 0x20b   :  { %508 = vmatmul.mubr.bf16.vlgmr.msra.gmra.mrb[4].mxu0 %v296_v43 }
 0x2de   :  { %v383_v45 = vpop.f32.mrb[4].mxu0 }
 0x2df   :  { %v384_v46 = vadd.f32 %v415_v44, %v383_v45  ;;  %v509_v47 = vpop.f32.mrb[5].mxu0 }
 0x2e0   :  { %v386_v48 = vpop.f32.mrb[6].mxu0 }
 0x2e1   :  { %390 = vst.msk [vmem:[%s712_s3] sm:$0xff] %vm389_vm2, %v384_v46  ;;  %v510_v49 = vpop.f32.mrb[7].mxu0 }
 0x2e2   :  { %395 = vsyncpa [#allocation4], 1 }
 0x2e3   :  { %396 = vsyncpa [#allocation6], 1 }

</bundles_post_ra>
